<compile_context>
chip_gen: v7x
topology: tpu7x:2x2x1
jax: 0.10.0
libtpu: 0.0.40
codegen_flags: <defaults>
</compile_context>

<pallas_src>
import functools

import jax
import jax.numpy as jnp
from jax import lax
from jax.experimental import pallas as pl
from jax.experimental.pallas import tpu as pltpu

EPS = 1e-08
_MIB = 1024 * 1024


def _cdiv(a, b):
    return -(-a // b)


def _round_up(x, m):
    return _cdiv(x, m) * m


def _vmem_limit_bytes():
    """Generation-aware scoped-VMEM request: ~half of physical VMEM, capped."""
    try:
        phys = pltpu.get_tpu_info().vmem_capacity_bytes
    except Exception:
        phys = 64 * _MIB  # conservative (v7x-class per-core VMEM)
    return int(min(phys // 2, 64 * _MIB))


def _pick_tk(K, M, n_in, n_out, in_itemsize, out_itemsize, vmem_limit,
             *, cap=1024, floor=256):
    """Pick the length tile TK.

    TK is a multiple of 128 (lane-dense, unmasked stores), sized so the
    double-buffered input + output blocks stay within ~half of the requested
    scoped-VMEM limit, at least `floor` (MXU fill on the fused path), and small
    enough that the grid has >= ~4 steps so the pipeline can double-buffer and
    both v7x TensorCores get work.
    """
    k128 = _round_up(max(K, 1), 128)
    budget = vmem_limit // 2
    per_col = 2 * (n_in * in_itemsize + n_out * out_itemsize)  # double-buffered
    tk = 128
    for cand in (1024, 896, 768, 640, 512, 384, 256, 128):
        if cand > cap or cand > k128:
            continue
        if cand * per_col > budget:
            continue
        tk = cand
        break
    floor_eff = max(128, min(floor, k128))
    while tk > floor_eff and M * _cdiv(K, tk) < 4:
        nxt = max(floor_eff, ((tk // 2) // 128) * 128)
        if nxt >= tk:
            break
        tk = nxt
    return tk


def _pad_len(x, k_to):
    K = x.shape[-1]
    if K == k_to:
        return x
    return jnp.pad(x, ((0, 0), (0, 0), (0, k_to - K)))


# ---------------------------------------------------------------------------
# Standalone cLN
# ---------------------------------------------------------------------------
def _cln_kernel(y_ref, g_ref, b_ref, o_ref, *, inv_n, fuse_log, log_tiny):
    # y_ref: (N, TK) — full channel extent, one length tile.
    y = y_ref[...].astype(jnp.float32)
    if fuse_log:
        y = jnp.log(jnp.maximum(jnp.abs(y), log_tiny))
    # Single-pass stats over channels (one traversal of the (N, TK) tile).
    s1 = jnp.sum(y, axis=0, keepdims=True)            # (1, TK)
    s2 = jnp.sum(y * y, axis=0, keepdims=True)        # (1, TK)
    mean = s1 * inv_n
    var = jnp.maximum(s2 * inv_n - mean * mean, 0.0)   # biased var (unbiased=False)
    inv_std = lax.rsqrt(var + EPS)                     # EUP rsqrt, per position
    out = (g_ref[...].astype(jnp.float32) * ((y - mean) * inv_std)
           + b_ref[...].astype(jnp.float32))
    o_ref[...] = out.astype(o_ref.dtype)


def channelwise_layer_norm(y, gamma, beta, *, tk=None, fuse_log_frontend=False):
    """cLN. y: [M, N, K]; gamma/beta: per-channel (any shape with N elements)."""
    M, N, K = y.shape
    gamma = gamma.reshape(N, 1).astype(jnp.float32)
    beta = beta.reshape(N, 1).astype(jnp.float32)

    vmem_limit = _vmem_limit_bytes()
    itm = y.dtype.itemsize
    TK = tk if tk is not None else _pick_tk(K, M, N, N, itm, itm, vmem_limit,
                                            floor=128)
    TK = min(_round_up(TK, 128), _round_up(K, 128))
    Kp = _round_up(K, TK)
    yp = _pad_len(y, Kp)

    kernel = functools.partial(
        _cln_kernel, inv_n=1.0 / N, fuse_log=fuse_log_frontend,
        log_tiny=float(jnp.finfo(y.dtype).eps))

    out = pl.pallas_call(
        kernel,
        out_shape=jax.ShapeDtypeStruct((M, N, Kp), y.dtype),
        grid_spec=pltpu.PrefetchScalarGridSpec(
            num_scalar_prefetch=0,
            grid=(M, Kp // TK),
            in_specs=[
                pl.BlockSpec((None, N, TK), lambda m, t: (m, 0, t)),
                pl.BlockSpec((N, 1), lambda m, t: (0, 0)),
                pl.BlockSpec((N, 1), lambda m, t: (0, 0)),
            ],
            out_specs=pl.BlockSpec((None, N, TK), lambda m, t: (m, 0, t)),
        ),
        compiler_params=pltpu.CompilerParams(
            dimension_semantics=("parallel", "parallel"),
            vmem_limit_bytes=vmem_limit,
        ),
    )(yp, gamma, beta)
    return out[:, :, :K] if Kp != K else out


# ---------------------------------------------------------------------------
# Fused [log|x| ->] cLN -> 1x1 bottleneck conv (gamma/beta folded into W/bias)
# ---------------------------------------------------------------------------
def _cln_conv1x1_kernel(y_ref, w_ref, bias_ref, o_ref, *, inv_n, fuse_log,
                        log_tiny):
    # y_ref: (N, TK); w_ref: (B, N) bf16 (gamma folded); bias_ref: (B, 1) f32.
    y = y_ref[...].astype(jnp.float32)
    if fuse_log:
        y = jnp.log(jnp.maximum(jnp.abs(y), log_tiny))
    s1 = jnp.sum(y, axis=0, keepdims=True)
    s2 = jnp.sum(y * y, axis=0, keepdims=True)
    mean = s1 * inv_n
    var = jnp.maximum(s2 * inv_n - mean * mean, 0.0)
    inv_std = lax.rsqrt(var + EPS)
    # gamma/beta are folded into w/bias in the wrapper: no per-element affine here.
    norm = ((y - mean) * inv_std).astype(jnp.bfloat16)
    # bf16 MXU matmul with f32 accumulation on the VMEM-resident tile.
    out = jnp.dot(w_ref[...], norm, preferred_element_type=jnp.float32)  # (B, TK)
    out = out + bias_ref[...]                                            # (B, 1) bias
    o_ref[...] = out.astype(o_ref.dtype)


def cln_bottleneck_conv1x1(y, gamma, beta, w, *, tk=None,
                           fuse_log_frontend=False):
    """Fused cLN + Conv1d(N -> B, kernel_size=1, bias=False).

    y: [M, N, K]; gamma/beta: per-channel; w: [B, N] (or [B, N, 1]).
    Returns [M, B, K]; the normalized activation never round-trips through HBM.
    """
    M, N, K = y.shape
    B = w.shape[0]
    gamma_f = gamma.reshape(1, N).astype(jnp.float32)
    beta_f = beta.reshape(N, 1).astype(jnp.float32)
    w_f = w.reshape(B, N).astype(jnp.float32)
    # Fold the cLN affine into the conv: W' = w * gamma, bias' = w @ beta.
    w_folded = (w_f * gamma_f).astype(jnp.bfloat16)   # (B, N) bf16 MXU operand
    bias_folded = w_f @ beta_f                        # (B, 1) f32

    vmem_limit = _vmem_limit_bytes()
    itm = y.dtype.itemsize
    TK = tk if tk is not None else _pick_tk(K, M, N, B, itm, itm, vmem_limit,
                                            floor=256)
    TK = min(_round_up(TK, 128), _round_up(K, 128))
    Kp = _round_up(K, TK)
    yp = _pad_len(y, Kp)

    kernel = functools.partial(
        _cln_conv1x1_kernel, inv_n=1.0 / N, fuse_log=fuse_log_frontend,
        log_tiny=float(jnp.finfo(y.dtype).eps))

    out = pl.pallas_call(
        kernel,
        out_shape=jax.ShapeDtypeStruct((M, B, Kp), y.dtype),
        grid_spec=pltpu.PrefetchScalarGridSpec(
            num_scalar_prefetch=0,
            grid=(M, Kp // TK),
            in_specs=[
                pl.BlockSpec((None, N, TK), lambda m, t: (m, 0, t)),
                pl.BlockSpec((B, N), lambda m, t: (0, 0)),
                pl.BlockSpec((B, 1), lambda m, t: (0, 0)),
            ],
            out_specs=pl.BlockSpec((None, B, TK), lambda m, t: (m, 0, t)),
        ),
        compiler_params=pltpu.CompilerParams(
            dimension_semantics=("parallel", "parallel"),
            vmem_limit_bytes=vmem_limit,
        ),
    )(yp, w_folded, bias_folded)
    return out[:, :, :K] if Kp != K else out


if __name__ == "__main__":
    # Small shapes consistent with the module's [M, N, K] layout.
    # K deliberately NOT a multiple of 128 to exercise the padding path.
    M, N, K = 2, 8, 1000     # batch, channels, length
    B = 16                   # bottleneck 1x1-conv output channels

    key = jax.random.PRNGKey(0)
    k1, k2, k3, k4 = jax.random.split(key, 4)

    mixture = jax.random.normal(k1, (M, N, K), dtype=jnp.float32)
    # Module init is gamma=1, beta=0; use non-trivial values to exercise kernels.
    gamma = 1.0 + 0.1 * jax.random.normal(k2, (N, 1), dtype=jnp.float32)
    beta = 0.1 * jax.random.normal(k3, (N, 1), dtype=jnp.float32)
    w = jax.random.normal(k4, (B, N), dtype=jnp.float32) / jnp.sqrt(N)

    # TemporalConvNet front-end reference: log(clamp(|x|, eps)) in plain JAX.
    tiny = jnp.finfo(mixture.dtype).eps
    y = jnp.log(jnp.maximum(jnp.abs(mixture), tiny))

    # Fused path: log|x| -> cLN -> bottleneck 1x1 conv in a single HBM round trip.
    # (Prefer this at every cLN->1x1-conv call site of the network.)
    fused_out = jax.block_until_ready(
        cln_bottleneck_conv1x1(mixture, gamma, beta, w, fuse_log_frontend=True))
    # Standalone cLN kernel (used where no 1x1 conv follows).
    cln_out = jax.block_until_ready(channelwise_layer_norm(y, gamma, beta))

    # Plain-JAX references mirroring the PyTorch forward.
    mean = jnp.mean(y, axis=1, keepdims=True)
    var = jnp.mean((y - mean) ** 2, axis=1, keepdims=True)
    cln_ref = gamma[None] * (y - mean) / jnp.sqrt(var + EPS) + beta[None]
    conv_ref = jnp.einsum("bn,mnk->mbk", w, cln_ref, precision="highest")

    assert cln_out.shape == (M, N, K) and fused_out.shape == (M, B, K)
    assert jnp.allclose(cln_out, cln_ref, atol=1e-3, rtol=1e-3), "cLN mismatch"
    # Looser tolerance: bf16 MXU operands with f32 accumulation (per the stated
    # precision budget), plus gamma folded into a bf16 weight.
    assert jnp.allclose(fused_out, conv_ref, atol=5e-2, rtol=5e-2), \
        "fused cLN + conv1x1 mismatch"

    print("KERNEL_OK")
</pallas_src>

<mosaic_0001>
module attributes {stable_mosaic.version = 11 : i64} {
  func.func @_cln_conv1x1_kernel(%arg0: i32, %arg1: i32, %arg2: memref<1x8x512xf32, #tpu.memory_space<vmem>>, %arg3: memref<16x8xbf16, #tpu.memory_space<vmem>>, %arg4: memref<16x1xf32, #tpu.memory_space<vmem>>, %arg5: memref<1x16x512xf32, #tpu.memory_space<vmem>>) attributes {dimension_semantics = [#tpu.dimension_semantics<parallel>, #tpu.dimension_semantics<parallel>], iteration_bounds = array<i64: 2, 2>, scalar_prefetch = 0 : i64, scratch_operands = 0 : i64, tpu.core_type = #tpu.core_type<tc>, window_params = [{transform_indices = @transform_0, window_bounds = array<i64: 1, 8, 512>}, {pipeline_mode = #tpu.pipeline_mode<synchronous>, transform_indices = @transform_1, window_bounds = array<i64: 16, 8>}, {pipeline_mode = #tpu.pipeline_mode<synchronous>, transform_indices = @transform_2, window_bounds = array<i64: 16, 1>}, {transform_indices = @transform_3, window_bounds = array<i64: 1, 16, 512>}]} {
    %c0 = arith.constant 0 : index
    %c0_0 = arith.constant 0 : index
    %c0_1 = arith.constant 0 : index
    %0 = vector.load %arg2[%c0, %c0_0, %c0_1] : memref<1x8x512xf32, #tpu.memory_space<vmem>>, vector<1x8x512xf32>
    %1 = vector.shape_cast %0 : vector<1x8x512xf32> to vector<8x512xf32>
    %2 = math.absf %1 : vector<8x512xf32>
    %cst = arith.constant 1.1920929E-7 : f32
    %3 = vector.broadcast %cst : f32 to vector<8x512xf32>
    %4 = arith.maximumf %2, %3 : vector<8x512xf32>
    %5 = math.log %4 : vector<8x512xf32>
    %cst_2 = arith.constant dense<0.000000e+00> : vector<512xf32>
    %6 = vector.multi_reduction <add>, %5, %cst_2 [0] : vector<8x512xf32> to vector<512xf32>
    %7 = vector.shape_cast %6 : vector<512xf32> to vector<1x512xf32>
    %8 = arith.mulf %5, %5 : vector<8x512xf32>
    %cst_3 = arith.constant dense<0.000000e+00> : vector<512xf32>
    %9 = vector.multi_reduction <add>, %8, %cst_3 [0] : vector<8x512xf32> to vector<512xf32>
    %10 = vector.shape_cast %9 : vector<512xf32> to vector<1x512xf32>
    %cst_4 = arith.constant 1.250000e-01 : f32
    %11 = vector.broadcast %cst_4 : f32 to vector<1x512xf32>
    %12 = arith.mulf %7, %11 : vector<1x512xf32>
    %cst_5 = arith.constant 1.250000e-01 : f32
    %13 = vector.broadcast %cst_5 : f32 to vector<1x512xf32>
    %14 = arith.mulf %10, %13 : vector<1x512xf32>
    %15 = arith.mulf %12, %12 : vector<1x512xf32>
    %16 = arith.subf %14, %15 : vector<1x512xf32>
    %cst_6 = arith.constant 0.000000e+00 : f32
    %17 = vector.broadcast %cst_6 : f32 to vector<1x512xf32>
    %18 = arith.maximumf %16, %17 : vector<1x512xf32>
    %cst_7 = arith.constant 9.99999993E-9 : f32
    %19 = vector.broadcast %cst_7 : f32 to vector<1x512xf32>
    %20 = arith.addf %18, %19 : vector<1x512xf32>
    %21 = math.rsqrt %20 : vector<1x512xf32>
    %22 = vector.broadcast %12 : vector<1x512xf32> to vector<8x512xf32>
    %23 = arith.subf %5, %22 : vector<8x512xf32>
    %24 = vector.broadcast %21 : vector<1x512xf32> to vector<8x512xf32>
    %25 = arith.mulf %23, %24 : vector<8x512xf32>
    %26 = arith.truncf %25 : vector<8x512xf32> to vector<8x512xbf16>
    %c0_8 = arith.constant 0 : index
    %c0_9 = arith.constant 0 : index
    %27 = vector.load %arg3[%c0_8, %c0_9] : memref<16x8xbf16, #tpu.memory_space<vmem>>, vector<16x8xbf16>
    %cst_10 = arith.constant dense<0.000000e+00> : vector<16x512xf32>
    %28 = tpu.matmul %27, %26, %cst_10 {dimension_numbers = #tpu.dot_dimension_numbers<[1], [0], [0], [1], [0, 0, 1, 1], [], []>} : vector<16x8xbf16>, vector<8x512xbf16>, vector<16x512xf32> -> vector<16x512xf32>
    %c0_11 = arith.constant 0 : index
    %c0_12 = arith.constant 0 : index
    %29 = vector.load %arg4[%c0_11, %c0_12] : memref<16x1xf32, #tpu.memory_space<vmem>>, vector<16x1xf32>
    %30 = vector.broadcast %29 : vector<16x1xf32> to vector<16x512xf32>
    %31 = arith.addf %28, %30 : vector<16x512xf32>
    %c0_13 = arith.constant 0 : index
    %c0_14 = arith.constant 0 : index
    %c0_15 = arith.constant 0 : index
    %32 = vector.load %arg5[%c0_13, %c0_14, %c0_15] : memref<1x16x512xf32, #tpu.memory_space<vmem>>, vector<1x16x512xf32>
    %33 = vector.shape_cast %32 : vector<1x16x512xf32> to vector<16x512xf32>
    %34 = vector.shape_cast %31 : vector<16x512xf32> to vector<1x16x512xf32>
    tpu.vector_store %arg5[%c0_13, %c0_14, %c0_15], %34 {strides = array<i32>} : memref<1x16x512xf32, #tpu.memory_space<vmem>>, vector<1x16x512xf32>,
    return
  }
  func.func @transform_0(%arg0: i32, %arg1: i32) -> (i32, i32, i32) {
    %c0_i32 = arith.constant 0 : i32
    %c0_i32_0 = arith.constant 0 : i32
    return %arg0, %c0_i32, %arg1 : i32, i32, i32
  }
  func.func @transform_1(%arg0: i32, %arg1: i32) -> (i32, i32) {
    %c0_i32 = arith.constant 0 : i32
    %c0_i32_0 = arith.constant 0 : i32
    %c0_i32_1 = arith.constant 0 : i32
    return %c0_i32, %c0_i32_0 : i32, i32
  }
  func.func @transform_2(%arg0: i32, %arg1: i32) -> (i32, i32) {
    %c0_i32 = arith.constant 0 : i32
    %c0_i32_0 = arith.constant 0 : i32
    %c0_i32_1 = arith.constant 0 : i32
    return %c0_i32, %c0_i32_0 : i32, i32
  }
  func.func @transform_3(%arg0: i32, %arg1: i32) -> (i32, i32, i32) {
    %c0_i32 = arith.constant 0 : i32
    %c0_i32_0 = arith.constant 0 : i32
    return %arg0, %c0_i32, %arg1 : i32, i32, i32
  }
}

</mosaic_0001>

<bundles_post_ra>
// kernel: tpu_custom_call.1
= control target key start
LH: loop header
LB: loop body
LE: loop exit
PB: predicated region body
PF: predicated region fallthrough
CT: control target
= control target key end

     0   :  { %8 = vsyncpa [#allocation3], 0  ;;  %s1068_s0 = inlined_call_operand.hbm [shape: f32[2,8,1024], index: 0, kind: input, shape index: {}]   ;;  %s1069_s1 = inlined_call_operand.vmem [shape: bf16[16,8], index: 1, kind: input, shape index: {}]   ;;  %s1070_s2 = inlined_call_operand.vmem [shape: f32[16,1], index: 2, kind: input, shape index: {}]   ;;  %s1071_s3 = inlined_call_operand.hbm [shape: f32[2,16,1024], index: 3, kind: output, shape index: {}]  }
   0x1   :  { %10 = vsyncpa [#allocation3 + $0x1], 0 }
   0x2   :  { %11 = vsyncpa [#allocation4], 0 }
   0x3   :  { %13 = vsyncpa [#allocation4 + $0x1], 0  ;;  %s834_s12 = smov 0   ;;  %s836_s13 = smov 0  }
   0x4   :  { %s838_s14 = smov 0   ;;  %s840_s15 = smov 0  }
   0x5   :  { %s842_s16 = smov 0   ;;  %s844_s17 = smov 0  }
   0x6   :  { %s846_s18 = smov 0   ;;  %s848_s19 = smov 0  }
   0x7 LB: > { %s556_s20 = sadd.s32 4294967295, %s806_s19   ;;  %s557_s21 = sadd.s32 4294967294, %s806_s19   ;;  %s806_s19 = sphi %s848_s19, %s19_s19   ;;  %s802_s18 = sphi %s846_s18, %s1088_s18   ;;  %s798_s17 = sphi %s844_s17, %s1087_s17   ;;  %s794_s16 = sphi %s842_s16, %s1086_s16   ;;  %s790_s15 = sphi %s840_s15, %s1085_s15   ;;  %s786_s14 = sphi %s838_s14, %s1084_s14   ;;  %s782_s13 = sphi %s836_s13, %s1083_s13   ;;  %s778_s12 = sphi %s834_s12, %s1082_s12  }
   0x8   : > { %s28_s22 = sadd.s32 1, %s798_s17  ;;  %s31_s23 = sadd.s32 1, %s802_s18 }
   0x9   : > { %p29_p0 = scmp.ge.s32.totalorder %s28_s22, 2  ;;  %s40_s24 = sadd.s32 1, %s786_s14 }
   0xa   : > { %p47_p1 = scmp.ne.s32.totalorder %s786_s14, %s782_s13  ;;  %p48_p2 = scmp.eq.s32.totalorder %s806_s19, 0 }
   0xb   : > { %s1090_s22 = smov (%p29_p0, %s28_s22), 0  ;;  %s1092_s23 = smov (!%p29_p0, %s31_s23), %s802_s18 }
   0xc   : > { %s36_s25 = ssub.s32 %s798_s17, %s1090_s22  ;;  %p887_p3 = por %p48_p2, %p47_p1 }
   0xd   : > { %p33_p4 = scmp.ge.s32.totalorder %s1092_s23, 2  ;;  %p53_p5 = scmp.ne.s32.totalorder %s782_s13, %s778_s12 }
   0xe   : > { %p54_p6 = scmp.eq.s32.totalorder %s556_s20, 0  ;;  %p121_p7 = scmp.eq.s32.totalorder %s556_s20, 3 }
   0xf   : > { %s1094_s23 = smov (%p33_p4, %s1092_s23), 0  ;;  %p127_p10 = scmp.eq.s32.totalorder %s557_s21, 3 }
  0x10   : > { %p895_p8 = por %p54_p6, %p53_p5  ;;  %p899_p9 = por %p121_p7, %p47_p1 }
  0x11   : > { %s35_s29 = ssub.s32 %s802_s18, %s1094_s23  ;;  %p905_p12 = por %p127_p10, %p53_p5 }
  0x12   : > { %s1075_s28 = scalar_select %p899_p9, 1, 0 }
  0x13   : > { %s37_s30 = sor.u32 %s36_s25, %s35_s29  ;;  %p590_p13 = scmp.lt.s32.totalorder %s806_s19, 4 }
  0x14   : > { %p38_p11 = scmp.eq.s32.totalorder %s37_s30, 0  ;;  %s153_s5 = sand.u32 1, %s786_s14  }
  0x15   : > { %s1076_s4 = scalar_select %p905_p12, 1, 0 }
  0x16   : > { %s912_s6 = scalar_select %p38_p11, %s786_s14, %s40_s24  }
  0x17   : > { %s560_s7 = sshll.u32 %s153_s5, 5  ;;  %s561_s8 = sshll.u32 %s798_s17, 2 }
  0x18   : > { %s562_s9 = sshll.u32 %s802_s18, 3  ;;  %s157_s10 = scalar_lea.vmem [#allocation2], %s560_s7 }
  0x19   : > { %s167_s11 = sshll.u32 %s157_s10, 4  ;;  %s163_s20 = sadd.s32 %s562_s9, %s561_s8  ;;  %s916_s11 = int_to_ptr.vmem [resolvable:$true] %s167_s11 }
  0x1a   : > { %s563_s21 = sshll.u32 %s163_s20, 7  ;;  %p920_p0 = pnand %p590_p13, %p887_p3 }
  0x1b   : > { %s927_s24 = scalar_lea.hbm %s1068_s0, %s563_s21  ;;  %s154_s7 = scalar_lea.sflag [#allocation3], %s153_s5 }
  0x1c   : > { %s678_s8 = scalar_lea.hbm %s927_s24, 512  ;;  %p680_p3 = pneg %p920_p0 }
  0x1d   : > { %p679_p4 = scmp.ne.s32.totalorder %s927_s24, %s678_s8  ;;  %s683_s10 = scalar_lea.hbm %s1068_s0, 2048 }
  0x1e   : > { %p684_p7 = scmp.lt.u32.totalorder %s927_s24, %s1068_s0  ;;  %p685_p10 = scmp.lt.u32.totalorder %s683_s10, %s678_s8 }
  0x1f   : > { %p681_p5 = pnand %p680_p3, %p679_p4  ;;  %p687_p13 = scmp.lt.u32.totalorder %s678_s8, %s927_s24 }
  0x20   : > { %p686_p11 = por %p685_p10, %p684_p7 }
  0x21   : > { %p682_p6 = pneg %p681_p5 }
  0x22   : > { %p688_p1 = por %p687_p13, %p686_p11 }
  0x24   : > { %p689_p2 = pnand %p688_p1, %p682_p6 }
  0x26   : > { %692 = shalt.err (!%p689_p2)
}
  0x27   : > { %s693_s5 = scalar_lea.vmem %s916_s11, 512  ;;  %s808_s29 = smov [#allocation2]  }
  0x28   : > { %p694_p4 = scmp.ne.s32.totalorder %s916_s11, %s693_s5  ;;  %s698_s30 = sshll.u32 %s808_s29, 4  ;;  %s699_s30 = int_to_ptr.vmem [resolvable:$false] %s698_s30 }
  0x29   : > { %s700_s26 = scalar_lea.vmem %s699_s30, 1024  ;;  %p701_p9 = scmp.lt.s32.totalorder %s916_s11, %s699_s30 }
  0x2a   : > { %p696_p5 = pnand %p694_p4, %p680_p3  ;;  %p702_p7 = scmp.lt.s32.totalorder %s700_s26, %s693_s5 }
  0x2c   : > { %p697_p12 = pneg %p696_p5  ;;  %p703_p10 = por %p702_p7, %p701_p9 }
  0x2e   : > { %p704_p11 = pnand %p703_p10, %p697_p12 }
  0x30   : > { %707 = shalt.err (!%p704_p11)
}
  0x31   : > { %585 = dma.hbm_to_vmem [thread:$0]  (!%p920_p0), %s927_s24, 512, %s916_s11, %s154_s7  }
  0x32   : > { %p1078_p1 = scmp.lt.s32.totalorder %s806_s19, 5  ;;  %p1079_p2 = scmp.ge.s32.totalorder %s806_s19, 1 }
  0x34   : > { %p173_p3 = pnand %p1079_p2, %p1078_p1 }
  0x35   : > { %s961_s8 = sand.u32 (!%p173_p3), 1, %s782_s13  }
  0x36   : > { %176 = sbr.rel (%p173_p3) target bundleno = 357 (0x165), region = 32  ;;  %s565_s9 = sshll.u32 (!%p173_p3), %s961_s8, 5 }
  0x37   : > { %s179_s10 = scalar_lea.sflag (!%p173_p3), [#allocation3], %s961_s8  ;;  %s182_s20 = scalar_lea.vmem (!%p173_p3), [#allocation2], %s565_s9 }
  0x3d   : > { %769 = dma.done.wait (%p895_p8), %s179_s10, 512  }
  0x3e   : > { %771 = vsyncadd (%p895_p8), %s179_s10, 4294966784  ;;  %v809_v0 = vmov 0   ;;  %v209_v1 = vld [vmem:[%s182_s20 + $0x8] sm:$0xff]  ;;  %v211_v2 = vld [vmem:[%s182_s20 + $0x18] sm:$0xff]  ;;  %vm343_vm0 = vcmask 1043456   ;;  %vm339_vm1 = vcmask 64512  }
  0x3f   : > { %388 = vmatprep.mubr.bf16.mxu0 %v809_v0  ;;  %431 = vmatprep.mubr.bf16.mxu1 %v809_v0  ;;  %v208_v3 = vld [vmem:[%s182_s20] sm:$0xff]  ;;  %v213_v4 = vand.u32 2147483647, %v209_v1  ;;  %v215_v5 = vand.u32 2147483647, %v211_v2  ;;  %v210_v7 = vld [vmem:[%s182_s20 + $0x10] sm:$0xff] }
  0x40   : > { %660 = vset.pattern.permute.xlu0 %v809_v0  ;;  %v212_v6 = vand.u32 2147483647, %v208_v3  ;;  %v214_v11 = vand.u32 2147483647, %v210_v7  ;;  %v322_v12 = vld [vmem:[%s1070_s2] sm:$0xff]  ;;  %v323_v14 = vld [vmem:[%s1070_s2 + $0x8] sm:$0xff] }
  0x41   : > { %v217_v8 = vmax.f32 %v213_v4, 1.1920929e-07  ;;  %v219_v9 = vmax.f32 %v215_v5, 1.1920929e-07  ;;  %326 = vperm.xlu0 %660, %v322_v12   ;;  %s573_s5 = sshll.u32 %s790_s15, 2  ;;  %s574_s29 = sshll.u32 %s794_s16, 4 }
  0x42   : > { %v216_v10 = vmax.f32 %v212_v6, 1.1920929e-07  ;;  %v218_v13 = vmax.f32 %v214_v11, 1.1920929e-07  ;;  %s566_s30 = sshll.u32 %s961_s8, 6  ;;  %s463_s26 = sadd.s32 %s574_s29, %s573_s5 }
  0x43   : > { %662 = vlog2.f32 %v217_v8  ;;  %s204_s9 = scalar_lea.vmem [#allocation5], %s566_s30  ;;  %s575_s20 = sshll.u32 %s463_s26, 7 }
  0x44   : > { %664 = vlog2.f32 %v219_v9  ;;  %s466_s10 = sshll.u32 %s204_s9, 4  ;;  %s1014_s11 = scalar_lea.hbm %s1071_s3, %s575_s20  ;;  %s1009_s10 = int_to_ptr.vmem [resolvable:$true] %s466_s10 }
  0x45   : > { %666 = vlog2.f32 %v216_v10  ;;  %331 = vperm.xlu0 %660, %v323_v14   ;;  %s451_s25 = scalar_lea.sflag [#allocation4], %s961_s8  ;;  %s708_s27 = scalar_lea.vmem %s1009_s10, 1024 }
  0x46   : > { %668 = vlog2.f32 %v218_v13  ;;  %p709_p8 = scmp.ne.s32.totalorder %s1009_s10, %s708_s27  ;;  %p1080_p9 = scmp.ne.s32.totalorder %s1075_s28, 0 }
  0x47   : > { %s810_s24 = smov [#allocation5]  }
  0x48   : > { %p710_p12 = pnand %p709_p8, %p1080_p9  ;;  %s712_s7 = sshll.u32 %s810_s24, 4  ;;  %s713_s7 = int_to_ptr.vmem [resolvable:$false] %s712_s7 }
  0x49   : > { %s714_s21 = scalar_lea.vmem %s713_s7, 2048  ;;  %p715_p6 = scmp.lt.s32.totalorder %s1009_s10, %s713_s7 }
  0x4a   : > { %p711_p0 = pneg %p710_p12  ;;  %p716_p13 = scmp.lt.s32.totalorder %s714_s21, %s708_s27 }
  0x4c   : > { %p717_p4 = por %p716_p13, %p715_p6 }
  0x4d   : > { %v663_v15 = vpop.eup %662 }
  0x4e   : > { %v665_v16 = vpop.eup %664  ;;  %v975_v17 = vmul.f32 0.6931472, %v663_v15  ;;  %p718_p5 = pnand %p717_p4, %p711_p0 }
  0x4f   : > { %v667_v18 = vpop.eup %666  ;;  %v977_v19 = vmul.f32 0.6931472, %v665_v16 }
  0x50   : > { %v669_v20 = vpop.eup %668  ;;  %v234_v21 = vrot.slane %v975_v17, 4  ;;  %v253_v22 = vmul.f32 %v975_v17, %v975_v17  ;;  %v982_v23 = vmul.f32 0.6931472, %v667_v18 }
  0x51   : > { %v246_v24 = vrot.slane %v977_v19, 4  ;;  %v255_v25 = vmul.f32 %v977_v19, %v977_v19  ;;  %v987_v26 = vmul.f32 0.6931472, %v669_v20 }
  0x52   : > { %v235_v27 = vadd.f32 %v234_v21, %v975_v17  ;;  %v262_v28 = vrot.slane %v253_v22, 4  ;;  %v228_v29 = vrot.slane %v982_v23, 4  ;;  %v252_v30 = vmul.f32 %v982_v23, %v982_v23 }
  0x53   : > { %v247_v31 = vadd.f32 %v246_v24, %v977_v19  ;;  %v274_v32 = vrot.slane %v255_v25, 4  ;;  %v240_v33 = vrot.slane %v987_v26, 4  ;;  %v254_v34 = vmul.f32 %v987_v26, %v987_v26 }
  0x54   : > { %v236_v35 = vrot.slane %v235_v27, 2  ;;  %v263_v36 = vadd.f32 %v262_v28, %v253_v22  ;;  %v229_v37 = vadd.f32 %v228_v29, %v982_v23  ;;  %v256_v38 = vrot.slane %v252_v30, 4 }
  0x55   : > { %v248_v39 = vrot.slane %v247_v31, 2  ;;  %v275_v40 = vadd.f32 %v274_v32, %v255_v25  ;;  %v241_v41 = vadd.f32 %v240_v33, %v987_v26  ;;  %v268_v42 = vrot.slane %v254_v34, 4 }
  0x56   : > { %v237_v43 = vadd.f32 %v236_v35, %v235_v27  ;;  %v264_v44 = vrot.slane %v263_v36, 2  ;;  %v230_v45 = vrot.slane %v229_v37, 2  ;;  %v257_v46 = vadd.f32 %v256_v38, %v252_v30 }
  0x57   : > { %v249_v47 = vadd.f32 %v248_v39, %v247_v31  ;;  %v276_v48 = vrot.slane %v275_v40, 2  ;;  %v242_v49 = vrot.slane %v241_v41, 2  ;;  %v269_v50 = vadd.f32 %v268_v42, %v254_v34 }
  0x58   : > { %v238_v51 = vrot.slane %v237_v43, 1  ;;  %v265_v52 = vadd.f32 %v264_v44, %v263_v36  ;;  %v231_v53 = vadd.f32 %v230_v45, %v229_v37  ;;  %v258_v54 = vrot.slane %v257_v46, 2 }
  0x59   : > { %v250_v55 = vrot.slane %v249_v47, 1  ;;  %v277_v56 = vadd.f32 %v276_v48, %v275_v40  ;;  %v243_v57 = vadd.f32 %v242_v49, %v241_v41  ;;  %v270_v58 = vrot.slane %v269_v50, 2 }
  0x5a   : > { %v239_v59 = vadd.f32 %v238_v51, %v237_v43  ;;  %v266_v60 = vrot.slane %v265_v52, 1  ;;  %v232_v61 = vrot.slane %v231_v53, 1  ;;  %v259_v62 = vadd.f32 %v258_v54, %v257_v46 }
  0x5b   : > { %v251_v63 = vadd.f32 %v250_v55, %v249_v47  ;;  %v278_v0 = vrot.slane %v277_v56, 1  ;;  %v244_v1 = vrot.slane %v243_v57, 1  ;;  %v271_v2 = vadd.f32 %v270_v58, %v269_v50 }
  0x5c   : > { %v267_v3 = vadd.f32 %v266_v60, %v265_v52  ;;  %v281_v4 = vmul.f32 0.125, %v239_v59  ;;  %v233_v5 = vadd.f32 %v232_v61, %v231_v53  ;;  %v260_v6 = vrot.slane %v259_v62, 1 }
  0x5d   : > { %v279_v7 = vadd.f32 %v278_v0, %v277_v56  ;;  %v283_v8 = vmul.f32 0.125, %v251_v63  ;;  %v245_v9 = vadd.f32 %v244_v1, %v243_v57  ;;  %v272_v10 = vrot.slane %v271_v2, 1 }
  0x5e   : > { %v285_v11 = vmul.f32 0.125, %v267_v3  ;;  %v289_v12 = vmul.f32 %v281_v4, %v281_v4  ;;  %v261_v13 = vadd.f32 %v260_v6, %v259_v62  ;;  %v280_v16 = vmul.f32 0.125, %v233_v5 }
  0x5f   : > { %v287_v14 = vmul.f32 0.125, %v279_v7  ;;  %v291_v15 = vmul.f32 %v283_v8, %v283_v8  ;;  %v273_v21 = vadd.f32 %v272_v10, %v271_v2  ;;  %v282_v22 = vmul.f32 0.125, %v245_v9 }
  0x60   : > { %v293_v18 = vsub.f32 %v285_v11, %v289_v12  ;;  %v284_v20 = vmul.f32 0.125, %v261_v13  ;;  %v288_v25 = vmul.f32 %v280_v16, %v280_v16  ;;  %v309_v39 = vsub.f32 %v975_v17, %v281_v4 }
  0x61   : > { %v295_v24 = vsub.f32 %v287_v14, %v291_v15  ;;  %v286_v28 = vmul.f32 0.125, %v273_v21  ;;  %v290_v29 = vmul.f32 %v282_v22, %v282_v22  ;;  %v311_v40 = vsub.f32 %v977_v19, %v283_v8 }
  0x62   : > { %v297_v27 = vmax.f32 %v293_v18, 0.0  ;;  %v292_v31 = vsub.f32 %v284_v20, %v288_v25  ;;  %v308_v42 = vsub.f32 %v982_v23, %v280_v16  ;;  %v310_v45 = vsub.f32 %v987_v26, %v282_v22  ;;  %v661_v26 = vld [vmem:[%s1069_s1] sm:$0xff]  }
  0x63   : > { %v299_v30 = vmax.f32 %v295_v24, 0.0  ;;  %v294_v33 = vsub.f32 %v286_v28, %v290_v29 }
  0x64   : > { %v301_v32 = vadd.f32 1e-08, %v297_v27  ;;  %v296_v35 = vmax.f32 %v292_v31, 0.0 }
  0x65   : > { %v303_v34 = vadd.f32 1e-08, %v299_v30  ;;  %v298_v36 = vmax.f32 %v294_v33, 0.0 }
  0x66   : > { %670 = vrsqrt.f32 %v301_v32  ;;  %v300_v37 = vadd.f32 1e-08, %v296_v35 }
  0x67   : > { %672 = vrsqrt.f32 %v303_v34  ;;  %v302_v38 = vadd.f32 1e-08, %v298_v36 }
  0x68   : > { %674 = vrsqrt.f32 %v300_v37 }
  0x69   : > { %676 = vrsqrt.f32 %v302_v38 }
  0x70   : > { %v671_v41 = vpop.eup %670 }
  0x71   : > { %v673_v43 = vpop.eup %672  ;;  %v313_v44 = vmul.f32 %v671_v41, %v309_v39 }
  0x72   : > { %v315_v46 = vmul.f32 %v673_v43, %v311_v40  ;;  %v675_v47 = vpop.eup %674 }
  0x73   : > { %v317_v48 = vpack.c.bf16 %v313_v44, %v313_v44  ;;  %v677_v49 = vpop.eup %676  ;;  %v312_v51 = vmul.f32 %v675_v47, %v308_v42 }
  0x74   : > { %v319_v50 = vpack.c.bf16 %v315_v46, %v315_v46  ;;  %v314_v17 = vmul.f32 %v677_v49, %v310_v45 }
  0x75   : > { %568 = vmatprep.subr.msk.bf16.mxu0 %vm343_vm0, %v317_v48  ;;  %v316_v19 = vpack.c.bf16 %v312_v51, %v312_v51 }
  0x76   : > { %570 = vmatprep.subr.msk.bf16.mxu1 %vm343_vm0, %v319_v50  ;;  %v318_v52 = vpack.c.bf16 %v314_v17, %v314_v17 }
  0x77   : > { %v345_v23 = vsel %vm343_vm0, %v316_v19, 0 }
  0x78   : > { %357 = vmatpush1.bf16.msra.mxu0 %v345_v23  ;;  %v351_v53 = vsel %vm343_vm0, %v318_v52, 0 }
  0x79   : > { %400 = vmatpush1.bf16.msra.mxu1 %v351_v53 }
  0x7b   : > { %569 = vmatmul.mubr.msk.bf16.vlgmr.msra.gmra.mrb[0].mxu0 %vm339_vm1, %v661_v26 }
  0x7c   : > { %571 = vmatmul.mubr.msk.bf16.vlgmr.msra.gmra.mrb[0].mxu1 %vm339_vm1, %v661_v26 }
  0xc0   : > { %v327_v54 = vpop.permute.xlu0 %326 }
  0xc4   : > { %v332_v55 = vpop.permute.xlu0 %331 }
 0x14e   : > { %v390_v56 = vpop.f32.mrb[0].mxu0 }
 0x14f   : > { %v391_v57 = vadd.f32 %v390_v56, %v327_v54  ;;  %v433_v58 = vpop.f32.mrb[0].mxu1  ;;  %v392_v59 = vpop.f32.mrb[1].mxu0 }
 0x150   : > { %v434_v60 = vadd.f32 %v433_v58, %v327_v54  ;;  %v393_v61 = vadd.f32 %v392_v59, %v327_v54  ;;  %v435_v62 = vpop.f32.mrb[1].mxu1  ;;  %v394_v63 = vpop.f32.mrb[2].mxu0 }
 0x151   : > { %442 = vst [vmem:[%s204_s9] sm:$0xff] %v391_v57  ;;  %v436_v0 = vadd.f32 %v435_v62, %v327_v54  ;;  %v395_v1 = vadd.f32 %v394_v63, %v332_v55  ;;  %v437_v2 = vpop.f32.mrb[2].mxu1  ;;  %v396_v3 = vpop.f32.mrb[3].mxu0 }
 0x152   : > { %444 = vst [vmem:[%s204_s9 + $0x10] sm:$0xff] %v434_v60  ;;  %443 = vst [vmem:[%s204_s9 + $0x8] sm:$0xff] %v393_v61  ;;  %v438_v4 = vadd.f32 %v437_v2, %v332_v55  ;;  %v397_v5 = vadd.f32 %v396_v3, %v332_v55  ;;  %v439_v6 = vpop.f32.mrb[3].mxu1 }
 0x153   : > { %445 = vst [vmem:[%s204_s9 + $0x18] sm:$0xff] %v436_v0  ;;  %446 = vst [vmem:[%s204_s9 + $0x20] sm:$0xff] %v395_v1  ;;  %v440_v7 = vadd.f32 %v439_v6, %v332_v55 }
 0x154   : > { %448 = vst [vmem:[%s204_s9 + $0x30] sm:$0xff] %v438_v4  ;;  %447 = vst [vmem:[%s204_s9 + $0x28] sm:$0xff] %v397_v5 }
 0x155   : > { %449 = vst [vmem:[%s204_s9 + $0x38] sm:$0xff] %v440_v7 }
 0x156   : > { %721 = shalt.err (!%p718_p5)
}
 0x157   : > { %s722_s5 = scalar_lea.hbm %s1014_s11, 1024  ;;  %s726_s26 = scalar_lea.hbm %s1071_s3, 4096 }
 0x158   : > { %p723_p7 = scmp.ne.s32.totalorder %s1014_s11, %s722_s5  ;;  %p727_p1 = scmp.lt.u32.totalorder %s1014_s11, %s1071_s3 }
 0x159   : > { %p728_p2 = scmp.lt.u32.totalorder %s726_s26, %s722_s5  ;;  %p730_p8 = scmp.lt.u32.totalorder %s722_s5, %s1014_s11 }
 0x15a   : > { %p724_p10 = pnand %p723_p7, %p1080_p9 }
 0x15b   : > { %p729_p3 = por %p728_p2, %p727_p1 }
 0x15c   : > { %p725_p11 = pneg %p724_p10 }
 0x15d   : > { %p731_p12 = por %p730_p8, %p729_p3 }
 0x15f   : > { %p732_p0 = pnand %p731_p12, %p725_p11 }
 0x161   : > { %735 = shalt.err (!%p732_p0)
}
 0x162   : > { %s811_s15 = smov 512   ;;  %s812_s16 = smov 1024  }
 0x163   : > { %s813_s27 = smov 32  }
 0x164   : > { %580 = dma.vmem_to_hbm [thread:$0]  (%p1080_p9), %s1009_s10, 1024, %s1014_s11, %s451_s25, %s811_s15, %s812_s16, %s813_s27  }
 0x165 PF: > { %p591_p6 = scmp.ge.s32.totalorder %s806_s19, 2  ;;  %s481_s24 = sand.u32 1, %s778_s12  }
 0x166   : > { %p1081_p13 = scmp.ne.s32.totalorder %s1076_s4, 0  ;;  %s482_s7 = scalar_lea.sflag [#allocation4], %s481_s24 }
 0x168   : > { %p587_p4 = pnand %p591_p6, %p1081_p13 }
 0x16a   : > { %773 = dma.done.wait (!%p587_p4), %s482_s7, 1024  }
 0x16b   : > { %775 = vsyncadd (!%p587_p4), %s482_s7, 4294966272  ;;  %s19_s19 = sadd.s32 1, %s806_s19   ;;  %s1082_s12 = smov %s782_s13 }
 0x16c   : > { %p16_p5 = scmp.ge.s32.totalorder %s19_s19, 6   ;;  %s1083_s13 = smov %s786_s14 }
 0x16d   : > { %s1084_s14 = smov %s912_s6  ;;  %s1085_s15 = smov %s798_s17 }
 0x16e   : > { %s1086_s16 = smov %s802_s18  ;;  %s1087_s17 = smov %s1090_s22 }
 0x16f   : > { %s1088_s18 = smov %s1094_s23  ;;  %18 = sbr.rel (!%p16_p5) target bundleno = 7 (0x7), region = 77 }
 0x176   :  { %487 = vsyncpa [#allocation3], 1 }
 0x177   :  { %489 = vsyncpa [#allocation3 + $0x1], 1 }
 0x178   :  { %490 = vsyncpa [#allocation4], 1 }
 0x179   :  { %492 = vsyncpa [#allocation4 + $0x1], 1 }

</bundles_post_ra>
